<compile_context>
chip_gen: v7x
topology: tpu7x:2x2x1
jax: 0.10.0
libtpu: 0.0.40
codegen_flags: <defaults>
</compile_context>

<pallas_src>
import jax
import jax.numpy as jnp
from jax.experimental import pallas as pl
from jax.experimental.pallas import tpu as pltpu


KTAPS = 5          # unified tap count (5-wide conv; 3-wide convs use taps 1..3)
PAD = KTAPS // 2   # sequence halo on each side
ROWS_CAP = 256     # max matmul-M rows (f32 accumulator) per grid step


# ----------------------------------------------------------------------------
# Pallas kernel
# ----------------------------------------------------------------------------
def _inception_kernel(x_ref, w_ref, o_ref, xp_ref):
    """Fused 3-conv Inception block for one B_TILE batch slab.

    x_ref : (B_TILE, H, K)        bf16 input rows, K = C * emb_dim
    w_ref : (KTAPS*K, OC_PAD)     bf16 fused im2col weight (resident)
    o_ref : (B_TILE, H, OC_PAD)   f32 lane-dense output slab
    xp_ref: (B_TILE, H+4, K)      f32 scratch: halo-padded slab
    """
    bt, h, k = x_ref.shape
    oc_pad = o_ref.shape[2]

    # Zero only the 2-row halos; the interior is fully overwritten each step.
    xp_ref[:, :PAD, :] = jnp.zeros((bt, PAD, k), jnp.float32)
    xp_ref[:, PAD + h:, :] = jnp.zeros((bt, PAD, k), jnp.float32)
    xp_ref[:, PAD:PAD + h, :] = x_ref[...].astype(jnp.float32)

    # im2col: fold the KTAPS taps into the contraction dimension.
    cols = jnp.concatenate(
        [xp_ref[:, kh:kh + h, :] for kh in range(KTAPS)], axis=-1)   # (bt, h, 5K)

    # Single MXU matmul: M = bt*h, contraction = KTAPS*K, N = OC_PAD.
    lhs = cols.reshape(bt * h, KTAPS * k).astype(jnp.bfloat16)
    acc = jnp.dot(lhs, w_ref[...], preferred_element_type=jnp.float32)
    o_ref[...] = acc.reshape(bt, h, oc_pad).astype(o_ref.dtype)


# ----------------------------------------------------------------------------
# Weight packing + wrapper
# ----------------------------------------------------------------------------
def _pack_weights(w_five, w_three, w_stride2, oc_pad):
    """Torch-layout (OC, C, kH, E) weights -> fused im2col (KTAPS*C*E, oc_pad) bf16."""
    oc, c, _, e = w_five.shape
    k = c * e

    def tap_major(w, taps):
        # (OC, C, taps, E) -> (taps, C, E, OC) -> (taps, C*E, OC)
        return jnp.transpose(w, (2, 1, 3, 0)).reshape(taps, k, oc)

    w5 = tap_major(w_five, 5)                                         # taps 0..4
    w3 = jnp.pad(tap_major(w_three, 3), ((1, 1), (0, 0), (0, 0)))     # taps 1..3
    ws2 = jnp.pad(tap_major(w_stride2, 3), ((1, 1), (0, 0), (0, 0)))  # taps 1..3
    w_full = jnp.concatenate([w5, w3, ws2], axis=-1)                  # (5, K, 3*OC)
    w_full = jnp.pad(w_full, ((0, 0), (0, 0), (0, oc_pad - w_full.shape[-1])))
    # Row index kh*K + (c*E + e) matches the kernel's im2col column ordering.
    return w_full.reshape(KTAPS * k, oc_pad).astype(jnp.bfloat16)


def _pick_batch_tile(n, h):
    """Largest divisor of n keeping b_tile*h <= ROWS_CAP (accumulator budget)."""
    cap = max(1, ROWS_CAP // max(h, 1))
    bt = 1
    for d in range(1, n + 1):
        if n % d == 0 and d <= cap:
            bt = d
    return bt


def inception_forward(x, w_five, w_three, w_stride2):
    """Pallas implementation of Inception.forward.

    x: (N, C, H, W) with W == emb_dim.  Returns (N, 1, H, 3*out_channels_per_conv),
    matching torch.cat((five, three, stride2), dim=1).permute(0, 3, 2, 1).
    """
    n, c, h, w = x.shape
    ocpc = w_five.shape[0]
    # The stride-(1,2) reinterpretation is valid only because kW == emb_dim and
    # pad_W == 0 (width collapses to a single output column).  Pin that here.
    assert w_five.shape == (ocpc, c, 5, w), (w_five.shape, x.shape)
    assert w_three.shape == (ocpc, c, 3, w), (w_three.shape, x.shape)
    assert w_stride2.shape == (ocpc, c, 3, w), (w_stride2.shape, x.shape)

    k = c * w
    oc = 3 * ocpc
    oc_pad = ((oc + 127) // 128) * 128            # lane-dense output width

    w_full = _pack_weights(w_five, w_three, w_stride2, oc_pad)        # (5K, oc_pad)

    # (N, C, H, E) -> (N, H, C*E).  For C == 1 (module default) this is a pure
    # reshape, so the only wrapper pass over x is the fused reshape + bf16 cast.
    if c == 1:
        x2d = x.reshape(n, h, k)
    else:
        x2d = jnp.transpose(x, (0, 2, 1, 3)).reshape(n, h, k)
    x2d = x2d.astype(jnp.bfloat16)

    b_tile = _pick_batch_tile(n, h)
    grid = (n // b_tile,)

    cost = pl.CostEstimate(
        flops=2 * n * h * (KTAPS * k) * oc_pad,
        transcendentals=0,
        bytes_accessed=x2d.size * 2 + w_full.size * 2 + n * h * oc_pad * 4,
    )

    # TODO(synk): for long sequences, additionally tile H with a 2-row halo
    # (overlapping input blocks) sized for v7x's 32 MiB scoped VMEM, and
    # single-buffer the resident weight block when C*E is large.
    out = pl.pallas_call(
        _inception_kernel,
        out_shape=jax.ShapeDtypeStruct((n, h, oc_pad), jnp.float32),
        grid=grid,
        in_specs=[
            pl.BlockSpec((b_tile, h, k), lambda i: (i, 0, 0)),
            pl.BlockSpec((KTAPS * k, oc_pad), lambda i: (0, 0)),      # resident
        ],
        out_specs=pl.BlockSpec((b_tile, h, oc_pad), lambda i: (i, 0, 0)),
        scratch_shapes=[pltpu.VMEM((b_tile, h + 2 * PAD, k), jnp.float32)],
        compiler_params=pltpu.CompilerParams(
            dimension_semantics=("parallel",),
        ),
        cost_estimate=cost,
    )(x2d, w_full)

    # Drop the lane padding; restore the cat(dim=1).permute(0,3,2,1) layout.
    return out[:, None, :, :oc]                                       # (N, 1, H, 3*ocpc)


# ----------------------------------------------------------------------------
# Pure-XLA reference (exact PyTorch semantics) for correctness checks.
# ----------------------------------------------------------------------------
def _conv_ref(x, w, stride, padding):
    return jax.lax.conv_general_dilated(
        x, w, window_strides=stride,
        padding=[(padding[0], padding[0]), (padding[1], padding[1])],
        dimension_numbers=("NCHW", "OIHW", "NCHW"),
        preferred_element_type=jnp.float32,
        precision=jax.lax.Precision.HIGHEST,
    )


def inception_reference(x, w_five, w_three, w_stride2):
    o5 = _conv_ref(x, w_five, (1, 1), (2, 0))
    o3 = _conv_ref(x, w_three, (1, 1), (1, 0))
    os2 = _conv_ref(x, w_stride2, (1, 2), (1, 0))
    out = jnp.concatenate([o5, o3, os2], axis=1)      # (N, 3*OC, H, 1)
    return jnp.transpose(out, (0, 3, 2, 1))           # (N, 1, H, 3*OC)


# ----------------------------------------------------------------------------
if __name__ == "__main__":
    def run_case(n, c, h, e, ocpc, key):
        kx, k5, k3, ks2 = jax.random.split(key, 4)
        x = jax.random.normal(kx, (n, c, h, e), jnp.float32)

        def init(kk, taps):
            fan_in = c * taps * e
            return jax.random.normal(
                kk, (ocpc, c, taps, e), jnp.float32) * (fan_in ** -0.5)

        w5, w3, ws2 = init(k5, 5), init(k3, 3), init(ks2, 3)

        out = jax.jit(inception_forward)(x, w5, w3, ws2)
        jax.block_until_ready(out)

        assert out.shape == (n, 1, h, 3 * ocpc), out.shape
        assert bool(jnp.all(jnp.isfinite(out)))

        # Tight check against a reference fed the SAME bf16-rounded operands
        # (catches packing / indexing bugs; only accumulation order differs).
        xb = x.astype(jnp.bfloat16)
        w5b, w3b, ws2b = (a.astype(jnp.bfloat16) for a in (w5, w3, ws2))
        ref_bf16 = inception_reference(xb, w5b, w3b, ws2b)
        err_bf16 = float(jnp.max(jnp.abs(out - ref_bf16)))
        assert jnp.allclose(out, ref_bf16, rtol=2e-3, atol=2e-3), err_bf16

        # Looser sanity check vs the full-f32 reference (covers bf16 rounding).
        ref_f32 = inception_reference(x, w5, w3, ws2)
        err_f32 = float(jnp.max(jnp.abs(out - ref_f32)))
        assert jnp.allclose(out, ref_f32, rtol=5e-2, atol=5e-2), err_f32

    root = jax.random.PRNGKey(0)
    key_a, key_b = jax.random.split(root)
    # Module defaults: in_channels=1, out_channels_per_conv=16.
    run_case(n=2, c=1, h=16, e=32, ocpc=16, key=key_a)
    # Exercises the C > 1 packing / transpose path and an odd batch tile.
    run_case(n=3, c=2, h=24, e=16, ocpc=16, key=key_b)

    print("KERNEL_OK")
</pallas_src>

<mosaic_0001>
module attributes {stable_mosaic.version = 11 : i64} {
  func.func @_inception_kernel(%arg0: i32, %arg1: memref<2x16x32xbf16, #tpu.memory_space<vmem>>, %arg2: memref<160x128xbf16, #tpu.memory_space<vmem>>, %arg3: memref<2x16x128xf32, #tpu.memory_space<vmem>>, %arg4: memref<2x20x32xf32, #tpu.memory_space<vmem>>) attributes {dimension_semantics = [#tpu.dimension_semantics<parallel>], iteration_bounds = array<i64: 1>, scalar_prefetch = 0 : i64, scratch_operands = 1 : i64, tpu.core_type = #tpu.core_type<tc>, window_params = [{transform_indices = @transform_0, window_bounds = array<i64: 2, 16, 32>}, {pipeline_mode = #tpu.pipeline_mode<synchronous>, transform_indices = @transform_1, window_bounds = array<i64: 160, 128>}, {transform_indices = @transform_2, window_bounds = array<i64: 2, 16, 128>}]} {
    %cst = arith.constant 0.000000e+00 : f32
    %0 = vector.broadcast %cst : f32 to vector<2x2x32xf32>
    %c0 = arith.constant 0 : index
    %c0_0 = arith.constant 0 : index
    %c0_1 = arith.constant 0 : index
    %1 = vector.load %arg4[%c0, %c0_0, %c0_1] : memref<2x20x32xf32, #tpu.memory_space<vmem>>, vector<2x2x32xf32>
    tpu.vector_store %arg4[%c0, %c0_0, %c0_1], %0 {strides = array<i32>} : memref<2x20x32xf32, #tpu.memory_space<vmem>>, vector<2x2x32xf32>,
    %cst_2 = arith.constant 0.000000e+00 : f32
    %2 = vector.broadcast %cst_2 : f32 to vector<2x2x32xf32>
    %c0_3 = arith.constant 0 : index
    %c18 = arith.constant 18 : index
    %c0_4 = arith.constant 0 : index
    %3 = vector.load %arg4[%c0_3, %c18, %c0_4] : memref<2x20x32xf32, #tpu.memory_space<vmem>>, vector<2x2x32xf32>
    tpu.vector_store %arg4[%c0_3, %c18, %c0_4], %2 {strides = array<i32>} : memref<2x20x32xf32, #tpu.memory_space<vmem>>, vector<2x2x32xf32>,
    %c0_5 = arith.constant 0 : index
    %c0_6 = arith.constant 0 : index
    %c0_7 = arith.constant 0 : index
    %4 = vector.load %arg1[%c0_5, %c0_6, %c0_7] : memref<2x16x32xbf16, #tpu.memory_space<vmem>>, vector<2x16x32xbf16>
    %5 = arith.extf %4 : vector<2x16x32xbf16> to vector<2x16x32xf32>
    %c0_8 = arith.constant 0 : index
    %c2 = arith.constant 2 : index
    %c0_9 = arith.constant 0 : index
    %6 = vector.load %arg4[%c0_8, %c2, %c0_9] : memref<2x20x32xf32, #tpu.memory_space<vmem>>, vector<2x16x32xf32>
    tpu.vector_store %arg4[%c0_8, %c2, %c0_9], %5 {strides = array<i32>} : memref<2x20x32xf32, #tpu.memory_space<vmem>>, vector<2x16x32xf32>,
    %c0_10 = arith.constant 0 : index
    %c0_11 = arith.constant 0 : index
    %c0_12 = arith.constant 0 : index
    %7 = vector.load %arg4[%c0_10, %c0_11, %c0_12] : memref<2x20x32xf32, #tpu.memory_space<vmem>>, vector<2x16x32xf32>
    %c0_13 = arith.constant 0 : index
    %c1 = arith.constant 1 : index
    %c0_14 = arith.constant 0 : index
    %8 = vector.load %arg4[%c0_13, %c1, %c0_14] : memref<2x20x32xf32, #tpu.memory_space<vmem>>, vector<2x16x32xf32>
    %c0_15 = arith.constant 0 : index
    %c2_16 = arith.constant 2 : index
    %c0_17 = arith.constant 0 : index
    %9 = vector.load %arg4[%c0_15, %c2_16, %c0_17] : memref<2x20x32xf32, #tpu.memory_space<vmem>>, vector<2x16x32xf32>
    %c0_18 = arith.constant 0 : index
    %c3 = arith.constant 3 : index
    %c0_19 = arith.constant 0 : index
    %10 = vector.load %arg4[%c0_18, %c3, %c0_19] : memref<2x20x32xf32, #tpu.memory_space<vmem>>, vector<2x16x32xf32>
    %c0_20 = arith.constant 0 : index
    %c4 = arith.constant 4 : index
    %c0_21 = arith.constant 0 : index
    %11 = vector.load %arg4[%c0_20, %c4, %c0_21] : memref<2x20x32xf32, #tpu.memory_space<vmem>>, vector<2x16x32xf32>
    %12 = tpu.concatenate %7, %8, %9, %10, %11 in 2 : vector<2x16x32xf32>, vector<2x16x32xf32>, vector<2x16x32xf32>, vector<2x16x32xf32>, vector<2x16x32xf32> -> vector<2x16x160xf32>
    %13 = vector.shape_cast %12 : vector<2x16x160xf32> to vector<32x160xf32>
    %14 = arith.truncf %13 : vector<32x160xf32> to vector<32x160xbf16>
    %c0_22 = arith.constant 0 : index
    %c0_23 = arith.constant 0 : index
    %15 = vector.load %arg2[%c0_22, %c0_23] : memref<160x128xbf16, #tpu.memory_space<vmem>>, vector<160x128xbf16>
    %cst_24 = arith.constant dense<0.000000e+00> : vector<32x128xf32>
    %16 = tpu.matmul %14, %15, %cst_24 {dimension_numbers = #tpu.dot_dimension_numbers<[1], [0], [0], [1], [0, 0, 1, 1], [], []>} : vector<32x160xbf16>, vector<160x128xbf16>, vector<32x128xf32> -> vector<32x128xf32>
    %17 = vector.shape_cast %16 : vector<32x128xf32> to vector<2x16x128xf32>
    %c0_25 = arith.constant 0 : index
    %c0_26 = arith.constant 0 : index
    %c0_27 = arith.constant 0 : index
    %18 = vector.load %arg3[%c0_25, %c0_26, %c0_27] : memref<2x16x128xf32, #tpu.memory_space<vmem>>, vector<2x16x128xf32>
    tpu.vector_store %arg3[%c0_25, %c0_26, %c0_27], %17 {strides = array<i32>} : memref<2x16x128xf32, #tpu.memory_space<vmem>>, vector<2x16x128xf32>,
    return
  }
  func.func @transform_0(%arg0: i32) -> (i32, i32, i32) {
    %c0_i32 = arith.constant 0 : i32
    %c0_i32_0 = arith.constant 0 : i32
    %c0_i32_1 = arith.constant 0 : i32
    return %arg0, %c0_i32, %c0_i32_0 : i32, i32, i32
  }
  func.func @transform_1(%arg0: i32) -> (i32, i32) {
    %c0_i32 = arith.constant 0 : i32
    %c0_i32_0 = arith.constant 0 : i32
    %c0_i32_1 = arith.constant 0 : i32
    return %c0_i32, %c0_i32_0 : i32, i32
  }
  func.func @transform_2(%arg0: i32) -> (i32, i32, i32) {
    %c0_i32 = arith.constant 0 : i32
    %c0_i32_0 = arith.constant 0 : i32
    %c0_i32_1 = arith.constant 0 : i32
    return %arg0, %c0_i32, %c0_i32_0 : i32, i32, i32
  }
}

</mosaic_0001>

<bundles_post_ra>
// kernel: inception_forward.1
= control target key start
LH: loop header
LB: loop body
LE: loop exit
PB: predicated region body
PF: predicated region fallthrough
CT: control target
= control target key end

     0   :  { %vm12_vm0 = vcmask 254976   ;;  %vm25_vm1 = vcmask 261120   ;;  %v345_v2 = vmov 0.0   ;;  %v346_v3 = vmov 0   ;;  %s347_s20 = smov 64   ;;  %s348_s21 = smov 32   ;;  %s447_s0 = inlined_call_operand.vmem [shape: bf16[2,16,32], index: 0, kind: input, shape index: {}]   ;;  %s448_s1 = inlined_call_operand.vmem [shape: bf16[160,128], index: 1, kind: input, shape index: {}]   ;;  %s449_s2 = inlined_call_operand.vmem [shape: f32[2,16,128], index: 2, kind: output, shape index: {}]  }
   0x1   :  { %v272_v0 = vld [vmem:[%s447_s0] sm:$0xff]   ;;  %v279_v1 = vld [vmem:[%s447_s0 + $0x8] sm:$0xff]   ;;  %13 = vst.msk [vmem:[#allocation2] sm:$0x3] %vm12_vm0, %v345_v2  ;;  %14 = vst.msk [vmem:[#allocation2 + $0x18] sm:$0x3] %vm12_vm0, %v345_v2  ;;  %202 = vmatprep.subr.bf16.mxu0 %v346_v3  ;;  %280 = vmatprep.subr.bf16.mxu1 %v346_v3 }
   0x2   :  { %15 = vst.msk [vmem:[#allocation2 + $0x12] sm:$0x3] %vm12_vm0, %v345_v2  ;;  %16 = vst.msk [vmem:[#allocation2 + $0x2a] sm:$0x3] %vm12_vm0, %v345_v2  ;;  %v273_v4 = vunpack.c.l.bf16 %v272_v0  ;;  %v274_v5 = vunpack.c.h.bf16 %v272_v0  ;;  %v277_v6 = vunpack.c.l.bf16 %v279_v1  ;;  %v278_v7 = vunpack.c.h.bf16 %v279_v1  ;;  %v335_v8 = vld [vmem:[%s448_s1] sm:$0xff]   ;;  %v336_v9 = vld [vmem:[%s448_s1 + $0x8] sm:$0xff]  }
   0x3   :  { %203 = vmatpush1.bf16.msra.mxu0 %v335_v8  ;;  %290 = vmatpush1.bf16.msra.mxu1 %v335_v8  ;;  %v337_v10 = vld [vmem:[%s448_s1 + $0x10] sm:$0xff]   ;;  %v338_v11 = vld [vmem:[%s448_s1 + $0x18] sm:$0xff]   ;;  %v339_v26 = vld [vmem:[%s448_s1 + $0x20] sm:$0xff]   ;;  %s349_s26 = smov 96   ;;  %vm102_vm2 = vcmask 523264   ;;  %vm107_vm3 = vcmask 785408  }
   0x4   :  { %26 = vst.msk [vmem:[#allocation2 + $0x2] sm:$0xff] %vm25_vm1, %v273_v4  ;;  %27 = vst.msk [vmem:[#allocation2 + $0xa] sm:$0xff] %vm25_vm1, %v274_v5  ;;  %204 = vmatprep.subr.bf16.mxu0 %v346_v3  ;;  %281 = vmatprep.subr.bf16.mxu1 %v346_v3  ;;  %v340_v37 = vld [vmem:[%s448_s1 + $0x28] sm:$0xff]   ;;  %v341_v38 = vld [vmem:[%s448_s1 + $0x30] sm:$0xff]  }
   0x5   :  { %28 = vst.msk [vmem:[#allocation2 + $0x1a] sm:$0xff] %vm25_vm1, %v277_v6  ;;  %29 = vst.msk [vmem:[#allocation2 + $0x22] sm:$0xff] %vm25_vm1, %v278_v7  ;;  %v342_v39 = vld [vmem:[%s448_s1 + $0x38] sm:$0xff]   ;;  %v343_v40 = vld [vmem:[%s448_s1 + $0x40] sm:$0xff]  }
   0x6   :  { %v344_v41 = vld [vmem:[%s448_s1 + $0x48] sm:$0xff]  }
   0x7   :  { %205 = vmatpush1.bf16.msra.mxu0 %v336_v9  ;;  %291 = vmatpush1.bf16.msra.mxu1 %v336_v9 }
   0x8   :  { %206 = vmatprep.subr.bf16.mxu0 %v346_v3  ;;  %282 = vmatprep.subr.bf16.mxu1 %v346_v3 }
   0xb   :  { %v38_v12 = vld [vmem:[#allocation2 + $0x2] sm:$0xff]  ;;  %v39_v13 = vld [vmem:[#allocation2 + $0xa] sm:$0xff]  ;;  %207 = vmatpush1.bf16.msra.mxu0 %v337_v10  ;;  %292 = vmatpush1.bf16.msra.mxu1 %v337_v10 }
   0xc   :  { %v34_v14 = vld [vmem:[#allocation2 + $0x1] sm:$0xff]  ;;  %v315_v15 = vpack.i.bf16 %v39_v13, %v38_v12  ;;  %v35_v16 = vld [vmem:[#allocation2 + $0x9] sm:$0xff]  ;;  %v36_v20 = vld [vmem:[#allocation2 + $0x19] sm:$0xff]  ;;  %208 = vmatprep.subr.bf16.mxu0 %v346_v3  ;;  %283 = vmatprep.subr.bf16.mxu1 %v346_v3 }
   0xd   :  { %v40_v17 = vld [vmem:[#allocation2 + $0x1a] sm:$0xff]  ;;  %v41_v18 = vld [vmem:[#allocation2 + $0x22] sm:$0xff]  ;;  %v305_v19 = vpack.i.bf16 %v35_v16, %v34_v14  ;;  %v43_v28 = vld [vmem:[#allocation2 + $0xb] sm:$0xff] }
   0xe   :  { %v37_v21 = vld [vmem:[#allocation2 + $0x21] sm:$0xff]  ;;  %316 = vrot.lane.b32.xlu1 %v315_v15, %s347_s20  ;;  %v320_v22 = vpack.i.bf16 %v41_v18, %v40_v17  ;;  %v47_v30 = vld [vmem:[#allocation2 + $0xc] sm:$0xff]  ;;  %v32_v49 = vld [vmem:[#allocation2 + $0x18] sm:$0xff] }
   0xf   :  { %306 = vrot.lane.b32.xlu0 %v305_v19, %s348_s21  ;;  %v310_v23 = vpack.i.bf16 %v37_v21, %v36_v20  ;;  %v44_v24 = vld [vmem:[#allocation2 + $0x1b] sm:$0xff]  ;;  %v45_v25 = vld [vmem:[#allocation2 + $0x23] sm:$0xff]  ;;  %209 = vmatpush1.bf16.msra.mxu0 %v338_v11 }
  0x10   :  { %v42_v27 = vld [vmem:[#allocation2 + $0x3] sm:$0xff]  ;;  %293 = vmatpush1.bf16.msra.mxu1 %v338_v11  ;;  %210 = vmatprep.subr.bf16.mxu0 %v346_v3  ;;  %v330_v32 = vpack.i.bf16 %v45_v25, %v44_v24 }
  0x11   :  { %284 = vmatprep.subr.bf16.mxu1 %v346_v3  ;;  %v46_v29 = vld [vmem:[#allocation2 + $0x4] sm:$0xff]  ;;  %v48_v31 = vld [vmem:[#allocation2 + $0x1c] sm:$0xff]  ;;  %v325_v35 = vpack.i.bf16 %v43_v28, %v42_v27 }
  0x12   :  { %321 = vrot.lane.b32.xlu1 %v320_v22, %s347_s20  ;;  %v113_v33 = vpack.c.bf16 %v47_v30, %v46_v29  ;;  %v49_v34 = vld [vmem:[#allocation2 + $0x24] sm:$0xff] }
  0x13   :  { %311 = vrot.lane.b32.xlu0 %v310_v23, %s348_s21  ;;  %v115_v36 = vpack.c.bf16 %v49_v34, %v48_v31  ;;  %211 = vmatpush1.bf16.msra.mxu0 %v339_v26  ;;  %v30_v46 = vld [vmem:[#allocation2] sm:$0xff]  ;;  %v31_v48 = vld [vmem:[#allocation2 + $0x8] sm:$0xff] }
  0x14   :  { %294 = vmatpush1.bf16.msra.mxu1 %v339_v26  ;;  %212 = vmatprep.subr.bf16.mxu0 %v346_v3  ;;  %v33_v50 = vld [vmem:[#allocation2 + $0x20] sm:$0xff] }
  0x15   :  { %285 = vmatprep.subr.bf16.mxu1 %v346_v3  ;;  %269 = vmatprep.mubr.msk.bf16.mxu0 %vm25_vm1, %v113_v33 }
  0x16   :  { %331 = vrot.lane.b32.xlu1 %v330_v32, %s349_s26  ;;  %270 = vmatprep.mubr.msk.bf16.mxu1 %vm25_vm1, %v115_v36 }
  0x17   :  { %326 = vrot.lane.b32.xlu0 %v325_v35, %s349_s26  ;;  %213 = vmatpush1.bf16.msra.mxu0 %v340_v37 }
  0x18   :  { %295 = vmatpush1.bf16.msra.mxu1 %v340_v37  ;;  %214 = vmatprep.subr.bf16.mxu0 %v346_v3 }
  0x19   :  { %286 = vmatprep.subr.bf16.mxu1 %v346_v3 }
  0x1b   :  { %215 = vmatpush1.bf16.msra.mxu0 %v341_v38 }
  0x1c   :  { %296 = vmatpush1.bf16.msra.mxu1 %v341_v38  ;;  %216 = vmatprep.subr.bf16.mxu0 %v346_v3 }
  0x1d   :  { %287 = vmatprep.subr.bf16.mxu1 %v346_v3 }
  0x1f   :  { %217 = vmatpush1.bf16.msra.mxu0 %v342_v39 }
  0x20   :  { %297 = vmatpush1.bf16.msra.mxu1 %v342_v39  ;;  %218 = vmatprep.subr.bf16.mxu0 %v346_v3 }
  0x21   :  { %288 = vmatprep.subr.bf16.mxu1 %v346_v3 }
  0x23   :  { %219 = vmatpush1.bf16.msra.mxu0 %v343_v40 }
  0x24   :  { %298 = vmatpush1.bf16.msra.mxu1 %v343_v40  ;;  %220 = vmatprep.subr.bf16.mxu0 %v346_v3 }
  0x25   :  { %289 = vmatprep.subr.bf16.mxu1 %v346_v3 }
  0x27   :  { %221 = vmatpush1.bf16.msra.mxu0 %v344_v41 }
  0x28   :  { %299 = vmatpush1.bf16.msra.mxu1 %v344_v41 }
  0x80   :  { %v317_v42 = vpop.permute.xlu1 %316 }
  0x81   :  { %v307_v43 = vpop.permute.xlu0 %306  ;;  %v319_v56 = vunpack.i.h.bf16 %v317_v42  ;;  %v318_v57 = vunpack.i.l.bf16 %v317_v42 }
  0x82   :  { %v309_v44 = vunpack.i.h.bf16 %v307_v43  ;;  %v308_v45 = vunpack.i.l.bf16 %v307_v43 }
  0x84   :  { %v322_v47 = vpop.permute.xlu1 %321  ;;  %v98_v58 = vsel %vm25_vm1, %v30_v46, %v308_v45  ;;  %v99_v59 = vsel %vm25_vm1, %v31_v48, %v309_v44 }
  0x85   :  { %v312_v51 = vpop.permute.xlu0 %311  ;;  %v324_v52 = vunpack.i.h.bf16 %v322_v47  ;;  %v323_v53 = vunpack.i.l.bf16 %v322_v47  ;;  %v103_v6 = vsel %vm102_vm2, %v98_v58, %v318_v57  ;;  %v104_v7 = vsel %vm102_vm2, %v99_v59, %v319_v56 }
  0x86   :  { %v314_v54 = vunpack.i.h.bf16 %v312_v51  ;;  %v313_v55 = vunpack.i.l.bf16 %v312_v51 }
  0x88   :  { %v101_v60 = vsel %vm25_vm1, %v33_v50, %v314_v54  ;;  %v100_v61 = vsel %vm25_vm1, %v32_v49, %v313_v55  ;;  %v332_v62 = vpop.permute.xlu1 %331 }
  0x89   :  { %v334_v63 = vunpack.i.h.bf16 %v332_v62  ;;  %v333_v0 = vunpack.i.l.bf16 %v332_v62  ;;  %v327_v1 = vpop.permute.xlu0 %326  ;;  %v105_v4 = vsel %vm102_vm2, %v100_v61, %v323_v53  ;;  %v106_v5 = vsel %vm102_vm2, %v101_v60, %v324_v52 }
  0x8a   :  { %v329_v2 = vunpack.i.h.bf16 %v327_v1  ;;  %v328_v3 = vunpack.i.l.bf16 %v327_v1 }
  0x8b   :  { %v110_v8 = vsel %vm107_vm3, %v105_v4, %v333_v0  ;;  %v111_v9 = vsel %vm107_vm3, %v106_v5, %v334_v63 }
  0x8c   :  { %v108_v10 = vsel %vm107_vm3, %v103_v6, %v328_v3  ;;  %v109_v11 = vsel %vm107_vm3, %v104_v7, %v329_v2  ;;  %v114_v12 = vpack.c.bf16 %v111_v9, %v110_v8 }
  0x8d   :  { %v112_v13 = vpack.c.bf16 %v109_v11, %v108_v10 }
  0x8e   :  { %243 = vmatmul.mubr.bf16.vlgmr.msra.gmra.mrb[0].mxu1 %v114_v12 }
  0x8f   :  { %235 = vmatmul.mubr.bf16.vlgmr.msra.gmra.mrb[0].mxu0 %v112_v13 }
 0x161   :  { %v244_v14 = vpop.f32.mrb[0].mxu1 }
 0x162   :  { %v236_v15 = vpop.f32.mrb[0].mxu0  ;;  %253 = vst [vmem:[%s449_s2 + $0x10] sm:$0xff] %v244_v14  ;;  %v246_v16 = vpop.f32.mrb[1].mxu1 }
 0x163   :  { %251 = vst [vmem:[%s449_s2] sm:$0xff] %v236_v15  ;;  %v238_v17 = vpop.f32.mrb[1].mxu0  ;;  %v247_v18 = vpop.f32.mrb[2].mxu1 }
 0x164   :  { %v239_v19 = vpop.f32.mrb[2].mxu0  ;;  %254 = vst [vmem:[%s449_s2 + $0x18] sm:$0xff] %v247_v18  ;;  %v249_v20 = vpop.f32.mrb[3].mxu1 }
 0x165   :  { %252 = vst [vmem:[%s449_s2 + $0x8] sm:$0xff] %v239_v19  ;;  %v241_v21 = vpop.f32.mrb[3].mxu0 }

</bundles_post_ra>
